<compile_context>
chip_gen: v6e
topology: v6e:2x2x1
jax: 0.10.0
libtpu: 0.0.40
codegen_flags: <defaults>
</compile_context>

<pallas_src>
import functools

import jax
import jax.numpy as jnp
from jax.experimental import pallas as pl
from jax.experimental.pallas import tpu as pltpu


# ----------------------------------------------------------------------------
# Fused residual-block kernel: one (1, C, tile_t) time tile per grid step.
# ----------------------------------------------------------------------------
def _residual_block_kernel(x_ref, xs_ref, cond_ref,
                           w_fg_x_ref, w_fg_cond_ref, b_fg_ref,
                           w_res_ref, w_skip_ref,
                           res_ref, skip_ref):
    """x:    (1, rc, tile_t) f32   current samples x[t]
       xs:   (1, rc, tile_t) f32   causally shifted samples x[t - dilation]
       cond: (1, cc, tile_t) f32   conditioning
       w_fg_x:    (2*dc, 2*rc) bf16  rows=[filter|gate], cols=[x_t | x_{t-d}]
       w_fg_cond: (2*dc, cc)   bf16
       b_fg:      (2*dc, 1)    f32   conditioning-conv bias
       w_res: (rc, dc) bf16,  w_skip: (sc, dc) bf16
       outputs: residual (1, rc, tile_t) f32, skip (1, sc, tile_t) f32."""
    dc = b_fg_ref.shape[0] // 2

    x_cur = x_ref[0]                                     # f32, reused in residual add
    # Pack the two dilated-conv taps along K -> one K=2*rc MXU matmul.
    x2 = jnp.concatenate([x_cur, xs_ref[0]], axis=0).astype(jnp.bfloat16)

    pre = jnp.dot(w_fg_x_ref[...], x2, preferred_element_type=jnp.float32)
    pre = pre + jnp.dot(w_fg_cond_ref[...], cond_ref[0].astype(jnp.bfloat16),
                        preferred_element_type=jnp.float32)
    pre = pre + b_fg_ref[...]                            # bias folded into same acc

    filt = jnp.tanh(pre[:dc, :])
    # Sigmoid via EUP exp + approx reciprocal (~1e-3 rel. error, inside tol).
    gate = pl.reciprocal(1.0 + jnp.exp(-pre[dc:, :]), approx=True)
    z = (filt * gate).astype(jnp.bfloat16)               # (dc, tile_t)

    # Lane-dense (tile_t-wide) stores for both outputs.
    res_ref[0] = jnp.dot(w_res_ref[...], z,
                         preferred_element_type=jnp.float32) + x_cur
    skip_ref[0] = jnp.dot(w_skip_ref[...], z,
                          preferred_element_type=jnp.float32)


# ----------------------------------------------------------------------------
# Wrapper: tile-size selection + pallas_call (no transposes, no reshapes).
# ----------------------------------------------------------------------------
def _pick_tile_t(T, requested, batch):
    """Largest multiple of 128 dividing T, <= requested, keeping >= 4 grid steps."""
    cands = [t for t in range(128, min(requested, T) + 1, 128) if T % t == 0]
    if not cands:
        return T                      # fall back to full-extent time blocks
    tile = max(cands)
    while batch * (T // tile) < 4 and min(cands) < tile:
        tile = max(t for t in cands if t < tile)
    return tile


def residual_block_forward(x, cond, kparams, *, dilation, tile_t=512):
    """x: (B, residual_channels, T) f32, cond: (B, cond_channels, T) f32.
    Returns (residual, skip), both (B, C, T) f32, matching the PyTorch module."""
    B, rc, T = x.shape
    cc = cond.shape[1]
    dc = kparams["b_fg"].shape[0] // 2
    sc = kparams["w_skip"].shape[0]

    tile_t = _pick_tile_t(T, tile_t, B)
    nt = pl.cdiv(T, tile_t)

    # Causally shifted tap stream: x_shift[:, :, t] = x[:, :, t - dilation]
    # (zero for t < dilation).  Left pad by `dilation`; right pad so the time
    # axis is a whole number of tiles (the right pad is never read).
    t_pad_total = pl.cdiv(T + dilation, tile_t) * tile_t
    x_shift = jnp.pad(x, ((0, 0), (0, 0), (dilation, t_pad_total - T - dilation)))

    def act_spec(c):
        return pl.BlockSpec((1, c, tile_t), lambda b, t: (b, 0, t))

    def full_spec(a):
        return pl.BlockSpec(a.shape, lambda b, t: (0,) * a.ndim)

    flops = 2 * B * T * (2 * dc * 2 * rc + 2 * dc * cc + rc * dc + sc * dc)
    bytes_accessed = 4 * B * T * (rc + rc + cc + rc + sc)   # x, x_shift, cond, res, skip
    cost = pl.CostEstimate(flops=flops,
                           transcendentals=2 * dc * B * T,
                           bytes_accessed=bytes_accessed)

    residual, skip = pl.pallas_call(
        _residual_block_kernel,
        grid_spec=pltpu.PrefetchScalarGridSpec(
            num_scalar_prefetch=0,
            grid=(B, nt),
            in_specs=[act_spec(rc),            # x[t]
                      act_spec(rc),            # x[t - dilation]
                      act_spec(cc),            # cond
                      full_spec(kparams["w_fg_x"]),
                      full_spec(kparams["w_fg_cond"]),
                      full_spec(kparams["b_fg"]),
                      full_spec(kparams["w_res"]),
                      full_spec(kparams["w_skip"])],
            out_specs=[act_spec(rc), act_spec(sc)],
        ),
        out_shape=[jax.ShapeDtypeStruct((B, rc, T), jnp.float32),
                   jax.ShapeDtypeStruct((B, sc, T), jnp.float32)],
        compiler_params=pltpu.CompilerParams(
            dimension_semantics=("parallel", "parallel"),
            vmem_limit_bytes=32 * 1024 * 1024),
        cost_estimate=cost,
    )(x, x_shift, cond,
      kparams["w_fg_x"], kparams["w_fg_cond"], kparams["b_fg"],
      kparams["w_res"], kparams["w_skip"])
    return residual, skip


# ----------------------------------------------------------------------------
# Parameters (PyTorch Conv1d layout) and one-time kernel-layout preparation.
# ----------------------------------------------------------------------------
def init_raw_params(key, *, dilation_channels=32, residual_channels=32,
                    skip_channels=256, kernel_size=2, cond_channels=128):
    assert kernel_size == 2, "only the module default kernel_size=2 is supported"
    ks = jax.random.split(key, 8)
    s = 0.05
    return dict(
        wf=s * jax.random.normal(ks[0], (dilation_channels, residual_channels, 2), jnp.float32),
        wg=s * jax.random.normal(ks[1], (dilation_channels, residual_channels, 2), jnp.float32),
        wr=s * jax.random.normal(ks[2], (residual_channels, dilation_channels, 1), jnp.float32),
        ws=s * jax.random.normal(ks[3], (skip_channels, dilation_channels, 1), jnp.float32),
        wcf=s * jax.random.normal(ks[4], (dilation_channels, cond_channels, 1), jnp.float32),
        wcg=s * jax.random.normal(ks[5], (dilation_channels, cond_channels, 1), jnp.float32),
        bcf=s * jax.random.normal(ks[6], (dilation_channels,), jnp.float32),
        bcg=s * jax.random.normal(ks[7], (dilation_channels,), jnp.float32),
    )


def prepare_kernel_params(raw):
    """One-time weight re-layout.  PyTorch Conv1d weights are (out, in, k); in
    channels-first matmul form they are used directly as the LHS (out, in).
    Tap k=1 acts on x[t], tap k=0 on x[t - dilation] (causal left pad)."""
    wf, wg = raw["wf"], raw["wg"]
    w_fg_x = jnp.block([[wf[:, :, 1], wf[:, :, 0]],
                        [wg[:, :, 1], wg[:, :, 0]]])             # (2*dc, 2*rc)
    w_fg_cond = jnp.concatenate([raw["wcf"][:, :, 0],
                                 raw["wcg"][:, :, 0]], axis=0)    # (2*dc, cc)
    b_fg = jnp.concatenate([raw["bcf"], raw["bcg"]]).reshape(-1, 1)
    return dict(
        w_fg_x=w_fg_x.astype(jnp.bfloat16),
        w_fg_cond=w_fg_cond.astype(jnp.bfloat16),
        b_fg=b_fg.astype(jnp.float32),
        w_res=raw["wr"][:, :, 0].astype(jnp.bfloat16),            # (rc, dc)
        w_skip=raw["ws"][:, :, 0].astype(jnp.bfloat16),           # (sc, dc)
    )


# ----------------------------------------------------------------------------
# Pure-JAX f32 reference (mirrors the PyTorch forward exactly).
# ----------------------------------------------------------------------------
def residual_block_reference(x, cond, raw, dilation):
    B, rc, T = x.shape
    xprev = jnp.pad(x, ((0, 0), (0, 0), (dilation, 0)))[:, :, :T]

    def tap(w2d, v):  # w2d: (out, in), v: (B, in, T)
        return jnp.einsum("oi,bit->bot", w2d, v)

    filt = tap(raw["wf"][:, :, 0], xprev) + tap(raw["wf"][:, :, 1], x)
    gate = tap(raw["wg"][:, :, 0], xprev) + tap(raw["wg"][:, :, 1], x)
    filt = filt + tap(raw["wcf"][:, :, 0], cond) + raw["bcf"][None, :, None]
    gate = gate + tap(raw["wcg"][:, :, 0], cond) + raw["bcg"][None, :, None]
    z = jnp.tanh(filt) * jax.nn.sigmoid(gate)
    residual = tap(raw["wr"][:, :, 0], z) + x
    skip = tap(raw["ws"][:, :, 0], z)
    return residual, skip


# ----------------------------------------------------------------------------
if __name__ == "__main__":
    key = jax.random.PRNGKey(0)
    k_param, k_x, k_c = jax.random.split(key, 3)

    # Module defaults: dilation_channels=32, residual_channels=32,
    # skip_channels=256, cond_channels=128, kernel_size=2.
    B, T, dilation = 2, 512, 2
    rc, dc, sc, cc = 32, 32, 256, 128

    raw = init_raw_params(k_param, dilation_channels=dc, residual_channels=rc,
                          skip_channels=sc, kernel_size=2, cond_channels=cc)
    kparams = prepare_kernel_params(raw)

    x = jax.random.normal(k_x, (B, rc, T), jnp.float32)
    cond = jax.random.normal(k_c, (B, cc, T), jnp.float32)

    fwd = jax.jit(functools.partial(residual_block_forward,
                                    dilation=dilation, tile_t=512))
    residual, skip = fwd(x, cond, kparams)
    residual, skip = jax.block_until_ready((residual, skip))

    assert residual.shape == (B, rc, T)
    assert skip.shape == (B, sc, T)
    assert bool(jnp.all(jnp.isfinite(residual)))
    assert bool(jnp.all(jnp.isfinite(skip)))

    # Validate against the pure-JAX f32 reference (bf16 MXU inputs -> loose tol).
    ref_res, ref_skip = residual_block_reference(x, cond, raw, dilation)
    err_r = float(jnp.max(jnp.abs(residual - ref_res)))
    err_s = float(jnp.max(jnp.abs(skip - ref_skip)))
    assert err_r < 5e-2 and err_s < 5e-2, (err_r, err_s)

    print("KERNEL_OK")
</pallas_src>

<mosaic_0001>
module attributes {stable_mosaic.version = 11 : i64} {
  func.func @_residual_block_kernel(%arg0: i32, %arg1: i32, %arg2: memref<1x32x256xf32, #tpu.memory_space<vmem>>, %arg3: memref<1x32x256xf32, #tpu.memory_space<vmem>>, %arg4: memref<1x128x256xf32, #tpu.memory_space<vmem>>, %arg5: memref<64x64xbf16, #tpu.memory_space<vmem>>, %arg6: memref<64x128xbf16, #tpu.memory_space<vmem>>, %arg7: memref<64x1xf32, #tpu.memory_space<vmem>>, %arg8: memref<32x32xbf16, #tpu.memory_space<vmem>>, %arg9: memref<256x32xbf16, #tpu.memory_space<vmem>>, %arg10: memref<1x32x256xf32, #tpu.memory_space<vmem>>, %arg11: memref<1x256x256xf32, #tpu.memory_space<vmem>>) attributes {dimension_semantics = [#tpu.dimension_semantics<parallel>, #tpu.dimension_semantics<parallel>], iteration_bounds = array<i64: 2, 2>, scalar_prefetch = 0 : i64, scratch_operands = 0 : i64, tpu.core_type = #tpu.core_type<tc>, window_params = [{transform_indices = @transform_0, window_bounds = array<i64: 1, 32, 256>}, {transform_indices = @transform_1, window_bounds = array<i64: 1, 32, 256>}, {transform_indices = @transform_2, window_bounds = array<i64: 1, 128, 256>}, {pipeline_mode = #tpu.pipeline_mode<synchronous>, transform_indices = @transform_3, window_bounds = array<i64: 64, 64>}, {pipeline_mode = #tpu.pipeline_mode<synchronous>, transform_indices = @transform_4, window_bounds = array<i64: 64, 128>}, {pipeline_mode = #tpu.pipeline_mode<synchronous>, transform_indices = @transform_5, window_bounds = array<i64: 64, 1>}, {pipeline_mode = #tpu.pipeline_mode<synchronous>, transform_indices = @transform_6, window_bounds = array<i64: 32, 32>}, {pipeline_mode = #tpu.pipeline_mode<synchronous>, transform_indices = @transform_7, window_bounds = array<i64: 256, 32>}, {transform_indices = @transform_8, window_bounds = array<i64: 1, 32, 256>}, {transform_indices = @transform_9, window_bounds = array<i64: 1, 256, 256>}]} {
    %c0 = arith.constant 0 : index
    %c0_0 = arith.constant 0 : index
    %c0_1 = arith.constant 0 : index
    %0 = vector.load %arg2[%c0, %c0_0, %c0_1] : memref<1x32x256xf32, #tpu.memory_space<vmem>>, vector<1x32x256xf32>
    %1 = vector.shape_cast %0 : vector<1x32x256xf32> to vector<32x256xf32>
    %c0_2 = arith.constant 0 : index
    %c0_3 = arith.constant 0 : index
    %c0_4 = arith.constant 0 : index
    %2 = vector.load %arg3[%c0_2, %c0_3, %c0_4] : memref<1x32x256xf32, #tpu.memory_space<vmem>>, vector<1x32x256xf32>
    %3 = vector.shape_cast %2 : vector<1x32x256xf32> to vector<32x256xf32>
    %4 = tpu.concatenate %1, %3 in 0 : vector<32x256xf32>, vector<32x256xf32> -> vector<64x256xf32>
    %5 = arith.truncf %4 : vector<64x256xf32> to vector<64x256xbf16>
    %c0_5 = arith.constant 0 : index
    %c0_6 = arith.constant 0 : index
    %6 = vector.load %arg5[%c0_5, %c0_6] : memref<64x64xbf16, #tpu.memory_space<vmem>>, vector<64x64xbf16>
    %cst = arith.constant dense<0.000000e+00> : vector<64x256xf32>
    %7 = tpu.matmul %6, %5, %cst {dimension_numbers = #tpu.dot_dimension_numbers<[1], [0], [0], [1], [0, 0, 1, 1], [], []>} : vector<64x64xbf16>, vector<64x256xbf16>, vector<64x256xf32> -> vector<64x256xf32>
    %c0_7 = arith.constant 0 : index
    %c0_8 = arith.constant 0 : index
    %8 = vector.load %arg6[%c0_7, %c0_8] : memref<64x128xbf16, #tpu.memory_space<vmem>>, vector<64x128xbf16>
    %c0_9 = arith.constant 0 : index
    %c0_10 = arith.constant 0 : index
    %c0_11 = arith.constant 0 : index
    %9 = vector.load %arg4[%c0_9, %c0_10, %c0_11] : memref<1x128x256xf32, #tpu.memory_space<vmem>>, vector<1x128x256xf32>
    %10 = vector.shape_cast %9 : vector<1x128x256xf32> to vector<128x256xf32>
    %11 = arith.truncf %10 : vector<128x256xf32> to vector<128x256xbf16>
    %cst_12 = arith.constant dense<0.000000e+00> : vector<64x256xf32>
    %12 = tpu.matmul %8, %11, %cst_12 {dimension_numbers = #tpu.dot_dimension_numbers<[1], [0], [0], [1], [0, 0, 1, 1], [], []>} : vector<64x128xbf16>, vector<128x256xbf16>, vector<64x256xf32> -> vector<64x256xf32>
    %13 = arith.addf %7, %12 : vector<64x256xf32>
    %c0_13 = arith.constant 0 : index
    %c0_14 = arith.constant 0 : index
    %14 = vector.load %arg7[%c0_13, %c0_14] : memref<64x1xf32, #tpu.memory_space<vmem>>, vector<64x1xf32>
    %15 = vector.broadcast %14 : vector<64x1xf32> to vector<64x256xf32>
    %16 = arith.addf %13, %15 : vector<64x256xf32>
    %17 = vector.extract_strided_slice %16 {offsets = [0, 0], sizes = [32, 256], strides = [1, 1]} : vector<64x256xf32> to vector<32x256xf32>
    %18 = math.tanh %17 : vector<32x256xf32>
    %19 = vector.extract_strided_slice %16 {offsets = [32, 0], sizes = [32, 256], strides = [1, 1]} : vector<64x256xf32> to vector<32x256xf32>
    %cst_15 = arith.constant 0.000000e+00 : f32
    %20 = vector.broadcast %cst_15 : f32 to vector<32x256xf32>
    %21 = arith.subf %20, %19 : vector<32x256xf32>
    %22 = math.exp %21 : vector<32x256xf32>
    %cst_16 = arith.constant 1.000000e+00 : f32
    %23 = vector.broadcast %cst_16 : f32 to vector<32x256xf32>
    %24 = arith.addf %23, %22 : vector<32x256xf32>
    %25 = tpu.reciprocal %24 {approx = true} : vector<32x256xf32> -> vector<32x256xf32>
    %26 = arith.mulf %18, %25 : vector<32x256xf32>
    %27 = arith.truncf %26 : vector<32x256xf32> to vector<32x256xbf16>
    %c0_17 = arith.constant 0 : index
    %c0_18 = arith.constant 0 : index
    %28 = vector.load %arg8[%c0_17, %c0_18] : memref<32x32xbf16, #tpu.memory_space<vmem>>, vector<32x32xbf16>
    %cst_19 = arith.constant dense<0.000000e+00> : vector<32x256xf32>
    %29 = tpu.matmul %28, %27, %cst_19 {dimension_numbers = #tpu.dot_dimension_numbers<[1], [0], [0], [1], [0, 0, 1, 1], [], []>} : vector<32x32xbf16>, vector<32x256xbf16>, vector<32x256xf32> -> vector<32x256xf32>
    %30 = arith.addf %29, %1 : vector<32x256xf32>
    %c0_20 = arith.constant 0 : index
    %c0_21 = arith.constant 0 : index
    %c0_22 = arith.constant 0 : index
    %31 = vector.load %arg10[%c0_20, %c0_21, %c0_22] : memref<1x32x256xf32, #tpu.memory_space<vmem>>, vector<1x32x256xf32>
    %32 = vector.shape_cast %31 : vector<1x32x256xf32> to vector<32x256xf32>
    %33 = vector.shape_cast %30 : vector<32x256xf32> to vector<1x32x256xf32>
    tpu.vector_store %arg10[%c0_20, %c0_21, %c0_22], %33 {strides = array<i32>} : memref<1x32x256xf32, #tpu.memory_space<vmem>>, vector<1x32x256xf32>,
    %c0_23 = arith.constant 0 : index
    %c0_24 = arith.constant 0 : index
    %34 = vector.load %arg9[%c0_23, %c0_24] : memref<256x32xbf16, #tpu.memory_space<vmem>>, vector<256x32xbf16>
    %cst_25 = arith.constant dense<0.000000e+00> : vector<256x256xf32>
    %35 = tpu.matmul %34, %27, %cst_25 {dimension_numbers = #tpu.dot_dimension_numbers<[1], [0], [0], [1], [0, 0, 1, 1], [], []>} : vector<256x32xbf16>, vector<32x256xbf16>, vector<256x256xf32> -> vector<256x256xf32>
    %c0_26 = arith.constant 0 : index
    %c0_27 = arith.constant 0 : index
    %c0_28 = arith.constant 0 : index
    %36 = vector.load %arg11[%c0_26, %c0_27, %c0_28] : memref<1x256x256xf32, #tpu.memory_space<vmem>>, vector<1x256x256xf32>
    %37 = vector.shape_cast %36 : vector<1x256x256xf32> to vector<256x256xf32>
    %38 = vector.shape_cast %35 : vector<256x256xf32> to vector<1x256x256xf32>
    tpu.vector_store %arg11[%c0_26, %c0_27, %c0_28], %38 {strides = array<i32>} : memref<1x256x256xf32, #tpu.memory_space<vmem>>, vector<1x256x256xf32>,
    return
  }
  func.func @transform_0(%arg0: i32, %arg1: i32) -> (i32, i32, i32) {
    %c0_i32 = arith.constant 0 : i32
    %c0_i32_0 = arith.constant 0 : i32
    return %arg0, %c0_i32, %arg1 : i32, i32, i32
  }
  func.func @transform_1(%arg0: i32, %arg1: i32) -> (i32, i32, i32) {
    %c0_i32 = arith.constant 0 : i32
    %c0_i32_0 = arith.constant 0 : i32
    return %arg0, %c0_i32, %arg1 : i32, i32, i32
  }
  func.func @transform_2(%arg0: i32, %arg1: i32) -> (i32, i32, i32) {
    %c0_i32 = arith.constant 0 : i32
    %c0_i32_0 = arith.constant 0 : i32
    return %arg0, %c0_i32, %arg1 : i32, i32, i32
  }
  func.func @transform_3(%arg0: i32, %arg1: i32) -> (i32, i32) {
    %c0_i32 = arith.constant 0 : i32
    %c0_i32_0 = arith.constant 0 : i32
    %c0_i32_1 = arith.constant 0 : i32
    return %c0_i32, %c0_i32_0 : i32, i32
  }
  func.func @transform_4(%arg0: i32, %arg1: i32) -> (i32, i32) {
    %c0_i32 = arith.constant 0 : i32
    %c0_i32_0 = arith.constant 0 : i32
    %c0_i32_1 = arith.constant 0 : i32
    return %c0_i32, %c0_i32_0 : i32, i32
  }
  func.func @transform_5(%arg0: i32, %arg1: i32) -> (i32, i32) {
    %c0_i32 = arith.constant 0 : i32
    %c0_i32_0 = arith.constant 0 : i32
    %c0_i32_1 = arith.constant 0 : i32
    return %c0_i32, %c0_i32_0 : i32, i32
  }
  func.func @transform_6(%arg0: i32, %arg1: i32) -> (i32, i32) {
    %c0_i32 = arith.constant 0 : i32
    %c0_i32_0 = arith.constant 0 : i32
    %c0_i32_1 = arith.constant 0 : i32
    return %c0_i32, %c0_i32_0 : i32, i32
  }
  func.func @transform_7(%arg0: i32, %arg1: i32) -> (i32, i32) {
    %c0_i32 = arith.constant 0 : i32
    %c0_i32_0 = arith.constant 0 : i32
    %c0_i32_1 = arith.constant 0 : i32
    return %c0_i32, %c0_i32_0 : i32, i32
  }
  func.func @transform_8(%arg0: i32, %arg1: i32) -> (i32, i32, i32) {
    %c0_i32 = arith.constant 0 : i32
    %c0_i32_0 = arith.constant 0 : i32
    return %arg0, %c0_i32, %arg1 : i32, i32, i32
  }
  func.func @transform_9(%arg0: i32, %arg1: i32) -> (i32, i32, i32) {
    %c0_i32 = arith.constant 0 : i32
    %c0_i32_0 = arith.constant 0 : i32
    return %arg0, %c0_i32, %arg1 : i32, i32, i32
  }
}

</mosaic_0001>

<bundles_post_ra>
// kernel: residual_block_forward.1
= control target key start
LH: loop header
LB: loop body
LE: loop exit
PB: predicated region body
PF: predicated region fallthrough
CT: control target
= control target key end

     0   :  { %s2669_s0 = inlined_call_operand.vmem [shape: f32[2,32,512], index: 0, kind: input, shape index: {}]   ;;  %s2670_s1 = inlined_call_operand.vmem [shape: f32[2,32,768], index: 1, kind: input, shape index: {}]   ;;  %s2671_s2 = inlined_call_operand.hbm [shape: f32[2,128,512], index: 2, kind: input, shape index: {}]   ;;  %s2672_s3 = inlined_call_operand.vmem [shape: bf16[64,64], index: 3, kind: input, shape index: {}]   ;;  %s2673_s4 = inlined_call_operand.vmem [shape: bf16[64,128], index: 4, kind: input, shape index: {}]   ;;  %s2674_s5 = inlined_call_operand.vmem [shape: f32[64,1], index: 5, kind: input, shape index: {}]   ;;  %s2675_s6 = inlined_call_operand.vmem [shape: bf16[32,32], index: 6, kind: input, shape index: {}]   ;;  %s2676_s7 = inlined_call_operand.vmem [shape: bf16[256,32], index: 7, kind: input, shape index: {}]   ;;  %s2677_s8 = inlined_call_operand.hbm [shape: f32[2,32,512], index: 8, kind: output, shape index: {0}]   ;;  %s2678_s9 = inlined_call_operand.hbm [shape: f32[2,256,512], index: 9, kind: output, shape index: {1}]  }
   0x1   :  { %2686 = sst [smem:[#allocation20_spill]] %s2669_s0 }
   0x2   :  { %2687 = sst [smem:[#allocation21_spill]] %s2670_s1 }
   0x3   :  { %2688 = sst [smem:[#allocation22_spill]] %s2678_s9 }
   0x4   :  { %15 = vsyncpa [#allocation5], 0 }
   0x5   :  { %17 = vsyncpa [#allocation5 + $0x1], 0 }
   0x6   :  { %18 = vsyncpa [#allocation6], 0 }
   0x7   :  { %20 = vsyncpa [#allocation6 + $0x1], 0 }
   0x8   :  { %21 = vsyncpa [#allocation9], 0 }
   0x9   :  { %23 = vsyncpa [#allocation9 + $0x1], 0  ;;  %s2083_s30 = smov 0   ;;  %s2085_s10 = smov 0  }
   0xa   :  { %s2087_s11 = smov 0   ;;  %s2089_s12 = smov 0  }
   0xb   :  { %s2091_s13 = smov 0   ;;  %s2093_s14 = smov 0  }
   0xc   :  { %s2095_s15 = smov 0   ;;  %s2097_s16 = smov 0  }
   0xd LB: > { %2689 = sst [smem:[#allocation13_spill]] %s1993_s30  ;;  %s1624_s17 = sadd.s32 4294967295, %s2021_s16   ;;  %s2021_s16 = sphi %s2097_s16, %s29_s16   ;;  %s2017_s15 = sphi %s2095_s15, %s2713_s15   ;;  %s2013_s14 = sphi %s2093_s14, %s2708_s14   ;;  %s2009_s13 = sphi %s2091_s13, %s2712_s13   ;;  %s2005_s12 = sphi %s2089_s12, %s2707_s12   ;;  %s2001_s11 = sphi %s2087_s11, %s2706_s11   ;;  %s1997_s10 = sphi %s2085_s10, %s2711_s10   ;;  %s1993_s30 = sphi %s2083_s30, %s2710_s30  }
   0xe   : > { %2690 = sst [smem:[#allocation14_spill]] %s2001_s11  ;;  %s1625_s18 = sadd.s32 4294967294, %s2021_s16  }
   0xf   : > { %2691 = sst [smem:[#allocation15_spill]] %s2013_s14  ;;  %s38_s19 = sadd.s32 1, %s2013_s14 }
  0x10   : > { %p39_p0 = scmp.ge.s32.totalorder %s38_s19, 2  ;;  %s41_s20 = sadd.s32 1, %s2017_s15 }
  0x11   : > { %p57_p1 = scmp.ne.s32.totalorder %s2001_s11, %s1997_s10  ;;  %p58_p2 = scmp.eq.s32.totalorder %s2021_s16, 0 }
  0x12   : > { %s2715_s19 = smov (%p39_p0, %s38_s19), 0  ;;  %s2717_s20 = smov (!%p39_p0, %s41_s20), %s2017_s15 }
  0x13   : > { %2692 = sst [smem:[#allocation16_spill]] %s2715_s19  ;;  %s46_s21 = ssub.s32 %s2013_s14, %s2715_s19 }
  0x14   : > { %p2135_p3 = por %p58_p2, %p57_p1  ;;  %p43_p4 = scmp.ge.s32.totalorder %s2717_s20, 2 }
  0x15   : > { %p119_p5 = scmp.ne.s32.totalorder %s1997_s10, %s1993_s30  ;;  %p120_p6 = scmp.eq.s32.totalorder %s1624_s17, 0 }
  0x16   : > { %p250_p7 = scmp.eq.s32.totalorder %s1624_s17, 3  ;;  %s2719_s20 = smov (%p43_p4, %s2717_s20), 0 }
  0x17   : > { %2694 = sst [smem:[#allocation17_spill]] %s2719_s20  ;;  %p2143_p8 = por %p120_p6, %p119_p5 }
  0x18   : > { %p2147_p9 = por %p250_p7, %p57_p1  ;;  %s45_s25 = ssub.s32 %s2017_s15, %s2719_s20 }
  0x19   : > { %p256_p10 = scmp.eq.s32.totalorder %s1625_s18, 3  ;;  %s47_s26 = sor.u32 %s46_s21, %s45_s25 }
  0x1a   : > { %s50_s27 = sadd.s32 1, %s2001_s11  ;;  %p48_p11 = scmp.eq.s32.totalorder %s47_s26, 0 }
  0x1b   : > { %p2154_p12 = por %p256_p10, %p119_p5  ;;  %p1627_p13 = scmp.ge.s32.totalorder %s2021_s16, 4 }
  0x1c   : > { %s2159_s29 = scalar_select %p48_p11, %s2001_s11, %s50_s27  }
  0x1d   : > { %s2697_s28 = scalar_select %p2154_p12, 1, 0 }
  0x1e   : > { %2699 = sst [smem:[#allocation19_spill]] %s2159_s29  ;;  %315 = sbr.rel (%p1627_p13) target bundleno = 81 (0x51), region = 36 }
  0x1f   : > { %2698 = sst [smem:[#allocation18_spill]] %s2697_s28 }
  0x23   : > { %318 = sbr.rel (!%p2135_p3) target bundleno = 49 (0x31), region = 40  ;;  %s320_s17 = sand.u32 (%p2135_p3), 1, %s2001_s11  }
  0x24   : > { %s1629_s18 = sshll.u32 (%p2135_p3), %s2013_s14, 1  ;;  %s1628_s21 = sshll.u32 (%p2135_p3), %s320_s17, 6 }
  0x25   : > { %s1630_s25 = sshll.u32 (%p2135_p3), %s2017_s15, 4  ;;  %s2700_s0 = sld [smem:[#allocation20_spill]] (%p2135_p3) }
  0x26   : > { %s325_s26 = sadd.s32 (%p2135_p3), %s1630_s25, %s1629_s18  ;;  %s322_s29 = scalar_lea.vmem (%p2135_p3), [#allocation2], %s1628_s21 }
  0x27   : > { %s1631_s20 = sshll.u32 (%p2135_p3), %s325_s26, 3 }
  0x2b   : > { %s327_s27 = scalar_lea.vmem %s2700_s0, %s1631_s20 }
  0x2c   : > { %v340_v0 = vld [vmem:[%s327_s27] sm:$0xff]  ;;  %v342_v1 = vld [vmem:[%s327_s27 + $0x8] sm:$0xff] }
  0x2d   : > { %v344_v2 = vld [vmem:[%s327_s27 + $0x20] sm:$0xff]  ;;  %341 = vst [vmem:[%s322_s29] sm:$0xff] %v340_v0  ;;  %343 = vst [vmem:[%s322_s29 + $0x8] sm:$0xff] %v342_v1  ;;  %v346_v3 = vld [vmem:[%s327_s27 + $0x28] sm:$0xff] }
  0x2e   : > { %345 = vst [vmem:[%s322_s29 + $0x10] sm:$0xff] %v344_v2  ;;  %v348_v4 = vld [vmem:[%s327_s27 + $0x40] sm:$0xff]  ;;  %v350_v5 = vld [vmem:[%s327_s27 + $0x48] sm:$0xff]  ;;  %347 = vst [vmem:[%s322_s29 + $0x18] sm:$0xff] %v346_v3 }
  0x2f   : > { %349 = vst [vmem:[%s322_s29 + $0x20] sm:$0xff] %v348_v4  ;;  %351 = vst [vmem:[%s322_s29 + $0x28] sm:$0xff] %v350_v5  ;;  %v352_v6 = vld [vmem:[%s327_s27 + $0x60] sm:$0xff]  ;;  %v354_v7 = vld [vmem:[%s327_s27 + $0x68] sm:$0xff] }
  0x30   : > { %353 = vst [vmem:[%s322_s29 + $0x30] sm:$0xff] %v352_v6  ;;  %355 = vst [vmem:[%s322_s29 + $0x38] sm:$0xff] %v354_v7 }
  0x31 PF: > { %361 = sbr.rel (!%p2135_p3) target bundleno = 63 (0x3f), region = 63  ;;  %s363_s30 = sand.u32 (%p2135_p3), 1, %s2001_s11  }
  0x32   : > { %s1633_s19 = sshll.u32 (%p2135_p3), %s2013_s14, 1  ;;  %s1632_s20 = sshll.u32 (%p2135_p3), %s363_s30, 6 }
  0x33   : > { %s1707_s17 = smul.u32 (%p2135_p3), 24, %s2017_s15  ;;  %s2701_s1 = sld [smem:[#allocation21_spill]] (%p2135_p3) }
  0x34   : > { %s365_s29 = scalar_lea.vmem (%p2135_p3), [#allocation3], %s1632_s20 }
  0x35   : > { %s368_s18 = sadd.s32 (%p2135_p3), %s1707_s17, %s1633_s19 }
  0x36   : > { %s1634_s21 = sshll.u32 %s368_s18, 3 }
  0x39   : > { %s370_s0 = scalar_lea.vmem %s2701_s1, %s1634_s21 }
  0x3a   : > { %v383_v8 = vld [vmem:[%s370_s0] sm:$0xff]  ;;  %v385_v9 = vld [vmem:[%s370_s0 + $0x8] sm:$0xff]  ;;  %v387_v10 = vld [vmem:[%s370_s0 + $0x30] sm:$0xff] }
  0x3b   : > { %384 = vst [vmem:[%s365_s29] sm:$0xff] %v383_v8  ;;  %386 = vst [vmem:[%s365_s29 + $0x8] sm:$0xff] %v385_v9  ;;  %v389_v11 = vld [vmem:[%s370_s0 + $0x38] sm:$0xff]  ;;  %v391_v12 = vld [vmem:[%s370_s0 + $0x60] sm:$0xff] }
  0x3c   : > { %388 = vst [vmem:[%s365_s29 + $0x10] sm:$0xff] %v387_v10  ;;  %v393_v13 = vld [vmem:[%s370_s0 + $0x68] sm:$0xff]  ;;  %390 = vst [vmem:[%s365_s29 + $0x18] sm:$0xff] %v389_v11  ;;  %v395_v14 = vld [vmem:[%s370_s0 + $0x90] sm:$0xff] }
  0x3d   : > { %392 = vst [vmem:[%s365_s29 + $0x20] sm:$0xff] %v391_v12  ;;  %394 = vst [vmem:[%s365_s29 + $0x28] sm:$0xff] %v393_v13  ;;  %v397_v15 = vld [vmem:[%s370_s0 + $0x98] sm:$0xff] }
  0x3e   : > { %396 = vst [vmem:[%s365_s29 + $0x30] sm:$0xff] %v395_v14  ;;  %398 = vst [vmem:[%s365_s29 + $0x38] sm:$0xff] %v397_v15 }
  0x3f PF: > { %s405_s27 = sand.u32 1, %s2001_s11   ;;  %s1636_s30 = sshll.u32 %s2013_s14, 1 }
  0x40   : > { %s1635_s19 = sshll.u32 %s405_s27, 8  ;;  %s1637_s20 = sshll.u32 %s2017_s15, 6 }
  0x41   : > { %s415_s17 = sadd.s32 %s1637_s20, %s1636_s30  ;;  %s409_s18 = scalar_lea.vmem [#allocation4], %s1635_s19 }
  0x42   : > { %s418_s21 = sshll.u32 %s409_s18, 4  ;;  %s1638_s25 = sshll.u32 %s415_s17, 7  ;;  %s419_s21 = int_to_ptr.vmem [resolvable:$true] %s418_s21 }
  0x43   : > { %s417_s0 = scalar_lea.hbm %s2671_s2, %s1638_s25  ;;  %s406_s28 = scalar_lea.sflag [#allocation5], %s405_s27 }
  0x44   : > { %s1881_s29 = scalar_lea.vmem %s419_s21, 4096  ;;  %s2023_s9 = smov [#allocation4]  }
  0x45   : > { %p1882_p0 = scmp.ne.s32.totalorder %s419_s21, %s1881_s29  ;;  %s1885_s11 = sshll.u32 %s2023_s9, 4  ;;  %s1886_s11 = int_to_ptr.vmem [resolvable:$false] %s1885_s11 }
  0x46   : > { %s1887_s14 = scalar_lea.vmem %s1886_s11, 8192  ;;  %p1888_p4 = scmp.lt.s32.totalorder %s419_s21, %s1886_s11 }
  0x47   : > { %p1883_p1 = pnand %p1882_p0, %p2135_p3  ;;  %p1889_p5 = scmp.lt.s32.totalorder %s1887_s14, %s1881_s29 }
  0x49   : > { %p1884_p2 = pneg %p1883_p1  ;;  %p1890_p6 = por %p1889_p5, %p1888_p4 }
  0x4b   : > { %p1891_p7 = pnand %p1890_p6, %p1884_p2 }
  0x4d   : > { %1894 = shalt.err (!%p1891_p7)
}
  0x4e   : > { %s2024_s30 = smov 512   ;;  %s2025_s19 = smov 256  }
  0x4f   : > { %s2026_s1 = smov 16  }
  0x50   : > { %1708 = dma.hbm_to_vmem [thread:$0]  (%p2135_p3), %s417_s0, 4096, %s419_s21, %s406_s28, %s2024_s30, %s2025_s19, %s2026_s1  }
  0x51 PF: > { %p1639_p10 = scmp.ge.s32.totalorder %s2021_s16, 1  ;;  %p426_p11 = scmp.lt.s32.totalorder %s2021_s16, 5 }
  0x53   : > { %p427_p13 = pnand %p1639_p10, %p426_p11 }
  0x54   : > { %s2191_s9 = sand.u32 (!%p427_p13), 1, %s1997_s10  }
  0x55   : > { %430 = sbr.rel (%p427_p13) target bundleno = 693 (0x2b5), region = 90  ;;  %s2194_s11 = sshll.u32 (!%p427_p13), %s2191_s9, 6 }
  0x56   : > { %s1642_s14 = sshll.u32 (!%p427_p13), %s2191_s9, 8  ;;  %s2198_s22 = scalar_lea.vmem (!%p427_p13), [#allocation2], %s2194_s11 }
  0x57   : > { %s2201_s28 = scalar_lea.vmem (!%p427_p13), [#allocation3], %s2194_s11  ;;  %s447_s27 = scalar_lea.sflag (!%p427_p13), [#allocation5], %s2191_s9 }
  0x58   : > { %s2204_s20 = scalar_lea.vmem (!%p427_p13), [#allocation4], %s1642_s14 }
  0x5a   : > { %1980 = dma.done.wait (%p2143_p8), %s447_s27, 4096  }
  0x5b   : > { %1982 = vsyncadd (%p2143_p8), %s447_s27, 4294963200  ;;  %v2027_v16 = vmov 0   ;;  %v573_v17 = vld [vmem:[%s2204_s20 + $0xe8] sm:$0xff]  ;;  %v575_v18 = vld [vmem:[%s2204_s20 + $0xf8] sm:$0xff]  ;;  %vm709_vm0 = vcmask 523264   ;;  %vm933_vm1 = vcmask 261120  }
  0x5c   : > { %754 = vmatprep.mubr.bf16.mxu1 %v2027_v16  ;;  %648 = vmatprep.mubr.bf16.mxu0 %v2027_v16  ;;  %v572_v19 = vld [vmem:[%s2204_s20 + $0xe0] sm:$0xff]  ;;  %v591_v20 = vpack.c.bf16 %v575_v18, %v573_v17  ;;  %v574_v21 = vld [vmem:[%s2204_s20 + $0xf0] sm:$0xff]  ;;  %v569_v22 = vld [vmem:[%s2204_s20 + $0xc8] sm:$0xff]  ;;  %s1644_s25 = sshll.u32 %s2191_s9, 9  ;;  %s2488_s0 = scalar_lea.vmem [#allocation7], %s2194_s11 }
  0x5d   : > { %1793 = vset.pattern.permute.xlu0 %v2027_v16  ;;  %1794 = vset.pattern.permute.xlu1 %v2027_v16  ;;  %v571_v23 = vld [vmem:[%s2204_s20 + $0xd8] sm:$0xff]  ;;  %v590_v24 = vpack.c.bf16 %v574_v21, %v572_v19  ;;  %v568_v26 = vld [vmem:[%s2204_s20 + $0xc0] sm:$0xff]  ;;  %v570_v27 = vld [vmem:[%s2204_s20 + $0xd0] sm:$0xff]  ;;  %s2484_s26 = scalar_lea.vmem [#allocation8], %s1644_s25  ;;  %s1695_s29 = sshll.u32 %s2005_s12, 1 }
  0x5e   : > { %v589_v25 = vpack.c.bf16 %v571_v23, %v569_v22  ;;  %v565_v28 = vld [vmem:[%s2204_s20 + $0xa8] sm:$0xff]  ;;  %616 = vmatprep.subr.bf16.mxu0 %v591_v20  ;;  %v567_v29 = vld [vmem:[%s2204_s20 + $0xb8] sm:$0xff]  ;;  %v588_v30 = vpack.c.bf16 %v570_v27, %v568_v26  ;;  %v516_v33 = vld [vmem:[%s2201_s28 + $0x20] sm:$0xff]  ;;  %s1696_s11 = sshll.u32 %s2009_s13, 4  ;;  %s1439_s19 = sshll.u32 %s2488_s0, 4  ;;  %s2510_s19 = int_to_ptr.vmem [resolvable:$true] %s1439_s19 }
  0x5f   : > { %617 = vmatpush1.bf16.msra.mxu0 %v590_v24  ;;  %v517_v31 = vld [vmem:[%s2201_s28 + $0x28] sm:$0xff]  ;;  %v519_v32 = vld [vmem:[%s2201_s28 + $0x38] sm:$0xff]  ;;  %v587_v34 = vpack.c.bf16 %v567_v29, %v565_v28  ;;  %v564_v35 = vld [vmem:[%s2204_s20 + $0xa0] sm:$0xff]  ;;  %s1436_s30 = sadd.s32 %s1696_s11, %s1695_s29  ;;  %s1419_s27 = scalar_lea.sflag [#allocation6], %s2191_s9 }
  0x60   : > { %618 = vmatprep.subr.bf16.mxu0 %v589_v25  ;;  %v566_v36 = vld [vmem:[%s2204_s20 + $0xb0] sm:$0xff]  ;;  %v527_v37 = vpack.c.bf16 %v519_v32, %v517_v31  ;;  %v561_v40 = vld [vmem:[%s2204_s20 + $0x88] sm:$0xff]  ;;  %v563_v41 = vld [vmem:[%s2204_s20 + $0x98] sm:$0xff]  ;;  %s1697_s1 = sshll.u32 %s1436_s30, 7  ;;  %s2028_s23 = smov [#allocation7]  }
  0x61   : > { %v518_v38 = vld [vmem:[%s2201_s28 + $0x30] sm:$0xff]  ;;  %v513_v42 = vld [vmem:[%s2201_s28 + $0x8] sm:$0xff]  ;;  %v515_v43 = vld [vmem:[%s2201_s28 + $0x18] sm:$0xff]  ;;  %v586_v46 = vpack.c.bf16 %v566_v36, %v564_v35  ;;  %v585_v51 = vpack.c.bf16 %v563_v41, %v561_v40  ;;  %s1899_s17 = sshll.u32 %s2028_s23, 4  ;;  %s1900_s17 = int_to_ptr.vmem [resolvable:$false] %s1899_s17 }
  0x62   : > { %v526_v39 = vpack.c.bf16 %v518_v38, %v516_v33  ;;  %730 = vmatprep.subr.bf16.mxu1 %v527_v37  ;;  %v512_v44 = vld [vmem:[%s2201_s28] sm:$0xff]  ;;  %v514_v45 = vld [vmem:[%s2201_s28 + $0x10] sm:$0xff]  ;;  %v525_v49 = vpack.c.bf16 %v515_v43, %v513_v42  ;;  %v557_v52 = vld [vmem:[%s2204_s20 + $0x68] sm:$0xff]  ;;  %s2518_s28 = scalar_lea.hbm %s2677_s8, %s1697_s1  ;;  %s1901_s18 = scalar_lea.vmem %s1900_s17, 2048 }
  0x63   : > { %619 = vmatpush1.bf16.msra.mxu0 %v588_v30  ;;  %v560_v47 = vld [vmem:[%s2204_s20 + $0x80] sm:$0xff]  ;;  %v562_v48 = vld [vmem:[%s2204_s20 + $0x90] sm:$0xff]  ;;  %v524_v50 = vpack.c.bf16 %v514_v45, %v512_v44  ;;  %v2240_v53 = vld [vmem:[%s2198_s22 + $0x28] sm:$0xff]  ;;  %p1902_p1 = scmp.lt.s32.totalorder %s2510_s19, %s1900_s17 }
  0x64   : > { %731 = vmatpush1.bf16.msra.mxu1 %v526_v39  ;;  %620 = vmatprep.subr.bf16.mxu0 %v587_v34  ;;  %v2243_v54 = vld [vmem:[%s2198_s22 + $0x38] sm:$0xff]  ;;  %v2249_v57 = vld [vmem:[%s2198_s22 + $0x20] sm:$0xff]  ;;  %v2252_v58 = vld [vmem:[%s2198_s22 + $0x30] sm:$0xff]  ;;  %v584_v59 = vpack.c.bf16 %v562_v48, %v560_v47 }
  0x65   : > { %732 = vmatprep.subr.bf16.mxu1 %v525_v49  ;;  %v559_v55 = vld [vmem:[%s2204_s20 + $0x78] sm:$0xff]  ;;  %v523_v56 = vpack.c.bf16 %v2243_v54, %v2240_v53  ;;  %v556_v60 = vld [vmem:[%s2204_s20 + $0x60] sm:$0xff]  ;;  %v522_v61 = vpack.c.bf16 %v2252_v58, %v2249_v57  ;;  %v2258_v62 = vld [vmem:[%s2198_s22 + $0x8] sm:$0xff] }
  0x66   : > { %v2261_v63 = vld [vmem:[%s2198_s22 + $0x18] sm:$0xff]  ;;  %v583_v0 = vpack.c.bf16 %v559_v55, %v557_v52  ;;  %v558_v1 = vld [vmem:[%s2204_s20 + $0x70] sm:$0xff]  ;;  %v2267_v3 = vld [vmem:[%s2198_s22] sm:$0xff] }
  0x67   : > { %621 = vmatpush1.bf16.msra.mxu0 %v586_v46  ;;  %v521_v2 = vpack.c.bf16 %v2261_v63, %v2258_v62  ;;  %v2270_v4 = vld [vmem:[%s2198_s22 + $0x10] sm:$0xff]  ;;  %v553_v5 = vld [vmem:[%s2204_s20 + $0x48] sm:$0xff]  ;;  %v555_v6 = vld [vmem:[%s2204_s20 + $0x58] sm:$0xff]  ;;  %v582_v7 = vpack.c.bf16 %v558_v1, %v556_v60 }
  0x68   : > { %733 = vmatpush1.bf16.msra.mxu1 %v524_v50  ;;  %622 = vmatprep.subr.bf16.mxu0 %v585_v51  ;;  %v552_v8 = vld [vmem:[%s2204_s20 + $0x40] sm:$0xff]  ;;  %v554_v9 = vld [vmem:[%s2204_s20 + $0x50] sm:$0xff]  ;;  %v520_v10 = vpack.c.bf16 %v2270_v4, %v2267_v3  ;;  %v581_v11 = vpack.c.bf16 %v555_v6, %v553_v5  ;;  %v549_v12 = vld [vmem:[%s2204_s20 + $0x28] sm:$0xff] }
  0x69   : > { %734 = vmatprep.subr.bf16.mxu1 %v523_v56  ;;  %v551_v13 = vld [vmem:[%s2204_s20 + $0x38] sm:$0xff]  ;;  %v548_v14 = vld [vmem:[%s2204_s20 + $0x20] sm:$0xff]  ;;  %v580_v17 = vpack.c.bf16 %v554_v9, %v552_v8  ;;  %v550_v18 = vld [vmem:[%s2204_s20 + $0x30] sm:$0xff] }
  0x6a   : > { %v1795_v15 = vld [vmem:[%s2672_s3] sm:$0xff]   ;;  %v579_v19 = vpack.c.bf16 %v551_v13, %v549_v12  ;;  %v545_v20 = vld [vmem:[%s2204_s20 + $0x8] sm:$0xff]  ;;  %v547_v21 = vld [vmem:[%s2204_s20 + $0x18] sm:$0xff]  ;;  %v578_v22 = vpack.c.bf16 %v550_v18, %v548_v14 }
  0x6b   : > { %623 = vmatpush1.bf16.msra.mxu0 %v584_v59  ;;  %v801_v23 = vld [vmem:[%s2674_s5 + $0x30] sm:$0xff]  ;;  %v799_v24 = vld [vmem:[%s2674_s5 + $0x20] sm:$0xff]  ;;  %v577_v25 = vpack.c.bf16 %v547_v21, %v545_v20  ;;  %v1797_v28 = vld [vmem:[%s2672_s3 + $0x8] sm:$0xff]  }
  0x6c   : > { %735 = vmatpush1.bf16.msra.mxu1 %v522_v61  ;;  %624 = vmatprep.subr.bf16.mxu0 %v583_v0  ;;  %v544_v26 = vld [vmem:[%s2204_s20] sm:$0xff]  ;;  %v546_v27 = vld [vmem:[%s2204_s20 + $0x10] sm:$0xff]  ;;  %v802_v29 = vld [vmem:[%s2674_s5 + $0x38] sm:$0xff]  ;;  %s1895_s20 = scalar_lea.vmem %s2510_s19, 1024 }
  0x6d   : > { %736 = vmatprep.subr.bf16.mxu1 %v521_v2  ;;  %835 = vperm.xlu0 %1793, %v801_v23   ;;  %v800_v30 = vld [vmem:[%s2674_s5 + $0x28] sm:$0xff]  ;;  %v576_v31 = vpack.c.bf16 %v546_v27, %v544_v26  ;;  %v797_v32 = vld [vmem:[%s2674_s5 + $0x10] sm:$0xff]  ;;  %v1796_v33 = vld [vmem:[%s2673_s4] sm:$0xff]   ;;  %p1896_p3 = scmp.ne.s32.totalorder %s2510_s19, %s1895_s20  ;;  %p1903_p2 = scmp.lt.s32.totalorder %s1901_s18, %s1895_s20 }
  0x6e   : > { %825 = vperm.xlu1 %1794, %v799_v24   ;;  %v798_v34 = vld [vmem:[%s2674_s5 + $0x18] sm:$0xff]  ;;  %v795_v35 = vld [vmem:[%s2674_s5] sm:$0xff]  ;;  %v1799_v36 = vld [vmem:[%s2672_s3 + $0x10] sm:$0xff]  }
  0x6f   : > { %625 = vmatpush1.bf16.msra.mxu0 %v582_v7  ;;  %v796_v37 = vld [vmem:[%s2674_s5 + $0x8] sm:$0xff]  ;;  %v1801_v39 = vld [vmem:[%s2672_s3 + $0x18] sm:$0xff]   ;;  %v1800_v40 = vld [vmem:[%s2673_s4 + $0x10] sm:$0xff]   ;;  %p1897_p8 = pnand %p1896_p3, %p2147_p9  ;;  %p1904_p4 = por %p1903_p2, %p1902_p1 }
  0x70   : > { %737 = vmatpush1.bf16.msra.mxu1 %v520_v10  ;;  %626 = vmatprep.subr.bf16.mxu0 %v581_v11  ;;  %v1798_v38 = vld [vmem:[%s2673_s4 + $0x8] sm:$0xff]   ;;  %v1802_v41 = vld [vmem:[%s2673_s4 + $0x18] sm:$0xff]  }
  0x71   : > { %840 = vperm.xlu0 %1793, %v802_v29   ;;  %p1898_p0 = pneg %p1897_p8 }
  0x72   : > { %830 = vperm.xlu1 %1794, %v800_v30  }
  0x73   : > { %1653 = vmatmul.mubr.msk.bf16.vlgmr.msra.gmra.mxu1 %vm709_vm0, %v1795_v15  ;;  %627 = vmatpush1.bf16.msra.mxu0 %v580_v17  ;;  %p1905_p5 = pnand %p1904_p4, %p1898_p0 }
  0x74   : > { %764 = vmatprep.mubr.bf16.mxu1 %v2027_v16  ;;  %628 = vmatprep.subr.bf16.mxu0 %v579_v19 }
  0x75   : > { %815 = vperm.xlu0 %1793, %v797_v32  }
  0x76   : > { %820 = vperm.xlu1 %1794, %v798_v34  }
  0x77   : > { %629 = vmatpush1.bf16.msra.mxu0 %v578_v22 }
  0x78   : > { %630 = vmatprep.subr.bf16.mxu0 %v577_v25 }
  0x79   : > { %805 = vperm.xlu0 %1793, %v795_v35  }
  0x7a   : > { %810 = vperm.xlu1 %1794, %v796_v37  }
  0x7b   : > { %1654 = vmatmul.mubr.msk.bf16.gmra.mxu1 %vm709_vm0, %v1797_v28  ;;  %631 = vmatpush1.bf16.msra.mxu0 %v576_v31 }
  0x7c   : > { %774 = vmatprep.mubr.bf16.mxu1 %v2027_v16 }
  0x7e   : > { %649 = vmatmul.mubr.bf16.vlgmr.msra.gmra.mxu0 %v1796_v33 }
  0x7f   : > { %658 = vmatprep.mubr.bf16.mxu0 %v2027_v16 }
  0x83   : > { %1655 = vmatmul.mubr.msk.bf16.gmra.mxu1 %vm709_vm0, %v1799_v36 }
  0x84   : > { %784 = vmatprep.mubr.bf16.mxu1 %v2027_v16 }
  0x86   : > { %659 = vmatmul.mubr.bf16.gmra.mxu0 %v1798_v38 }
  0x87   : > { %668 = vmatprep.mubr.bf16.mxu0 %v2027_v16 }
  0x8b   : > { %1656 = vmatmul.mubr.msk.bf16.gmra.mxu1 %vm709_vm0, %v1801_v39 }
  0x8c   : > { %972 = vmatprep.mubr.bf16.mxu1 %v2027_v16 }
  0x8e   : > { %669 = vmatmul.mubr.bf16.gmra.mxu0 %v1800_v40 }
  0x8f   : > { %678 = vmatprep.mubr.bf16.mxu0 %v2027_v16 }
  0x96   : > { %679 = vmatmul.mubr.bf16.gmra.mxu0 %v1802_v41 }
  0x97   : > { %1193 = vmatprep.mubr.bf16.mxu0 %v2027_v16 }
  0xe8   : > { %v836_v12 = vpop.permute.xlu0 %835 }
  0xe9   : > { %v826_v7 = vpop.permute.xlu1 %825 }
  0xec   : > { %v841_v30 = vpop.permute.xlu0 %840 }
  0xed   : > { %v831_v19 = vpop.permute.xlu1 %830 }
 0x133   : > { %v2346_v42 = vpop.f32.mrf.mxu1 }
 0x135   : > { %v2348_v43 = vpop.f32.mrf.mxu1 }
 0x137   : > { %v2350_v44 = vpop.f32.mrf.mxu1 }
 0x139   : > { %v2352_v45 = vpop.f32.mrf.mxu1 }
 0x13b   : > { %v2354_v46 = vpop.f32.mrf.mxu1 }
 0x13d   : > { %v2356_v47 = vpop.f32.mrf.mxu1 }
 0x13e   : > { %v2358_v48 = vpop.f32.mrf.mxu0 }
 0x13f   : > { %v2360_v49 = vpop.f32.mrf.mxu1 }
 0x140   : > { %v2362_v50 = vpop.f32.mrf.mxu0 }
 0x141   : > { %v2364_v51 = vpop.f32.mrf.mxu1 }
 0x142   : > { %v2366_v52 = vpop.f32.mrf.mxu0 }
 0x143   : > { %v776_v55 = vpop.f32.mrf.mxu1 }
 0x144   : > { %v2368_v56 = vpop.f32.mrf.mxu0 }
 0x145   : > { %v778_v59 = vpop.f32.mrf.mxu1 }
 0x146   : > { %v2370_v60 = vpop.f32.mrf.mxu0 }
 0x147   : > { %v780_v0 = vpop.f32.mrf.mxu1 }
 0x148   : > { %v2372_v61 = vpop.f32.mrf.mxu0 }
 0x149   : > { %v782_v5 = vpop.f32.mrf.mxu1 }
 0x14a   : > { %v2374_v1 = vpop.f32.mrf.mxu0 }
 0x14b   : > { %v786_v9 = vpop.f32.mrf.mxu1 }
 0x14c   : > { %v2376_v2 = vpop.f32.mrf.mxu0 }
 0x14d   : > { %v788_v17 = vpop.f32.mrf.mxu1 }
 0x14e   : > { %v670_v6 = vpop.f32.mrf.mxu0 }
 0x14f   : > { %v777_v15 = vadd.f32 %v776_v55, %v670_v6  ;;  %v790_v27 = vpop.f32.mrf.mxu1 }
 0x150   : > { %v672_v8 = vpop.f32.mrf.mxu0 }
 0x151   : > { %v779_v10 = vadd.f32 %v778_v59, %v672_v8  ;;  %v851_v25 = vadd.f32 %v826_v7, %v777_v15  ;;  %v792_v41 = vpop.f32.mrf.mxu1  ;;  %v816_v8 = vpop.permute.xlu0 %815 }
 0x152   : > { %v674_v11 = vpop.f32.mrf.mxu0 }
 0x153   : > { %v852_v13 = vadd.f32 %v826_v7, %v779_v10  ;;  %v781_v14 = vadd.f32 %v780_v0, %v674_v11  ;;  %v867_v39 = vsub.f32 0.0, %v851_v25 }
 0x154   : > { %v676_v18 = vpop.f32.mrf.mxu0 }
 0x155   : > { %v868_v20 = vsub.f32 0.0, %v852_v13  ;;  %v783_v21 = vadd.f32 %v782_v5, %v676_v18  ;;  %v853_v22 = vadd.f32 %v831_v19, %v781_v14  ;;  %v821_v13 = vpop.permute.xlu1 %820  ;;  %v875_v14 = vmul.f32 1.442695, %v867_v39 }
 0x156   : > { %v680_v23 = vpop.f32.mrf.mxu0  ;;  %v763_v18 = vadd.f32 %v2352_v45, %v2368_v56  ;;  %v773_v45 = vadd.f32 %v2364_v51, %v2376_v2 }
 0x157   : > { %v854_v24 = vadd.f32 %v831_v19, %v783_v21  ;;  %v877_v26 = vmul.f32 1.442695, %v868_v20  ;;  %v787_v28 = vadd.f32 %v786_v9, %v680_v23  ;;  %v869_v33 = vsub.f32 0.0, %v853_v22  ;;  %v806_v21 = vpop.permute.xlu0 %805 }
 0x158   : > { %v682_v29 = vpop.f32.mrf.mxu0  ;;  %v767_v20 = vadd.f32 %v2354_v46, %v2370_v60  ;;  %v769_v22 = vadd.f32 %v2356_v47, %v2372_v61  ;;  %v850_v60 = vadd.f32 %v821_v13, %v773_v45  ;;  %v1804_v45 = vld [vmem:[%s2675_s6 + $0x8] sm:$0xff]  }
 0x159   : > { %v870_v31 = vsub.f32 0.0, %v854_v24  ;;  %v789_v32 = vadd.f32 %v788_v17, %v682_v29  ;;  %v855_v34 = vadd.f32 %v836_v12, %v787_v28  ;;  %1821 = vpow2.f32 %v877_v26  ;;  %v811_v24 = vpop.permute.xlu1 %810 }
 0x15a   : > { %v684_v35 = vpop.f32.mrf.mxu0  ;;  %v879_v6 = vmul.f32 1.442695, %v869_v33  ;;  %v759_v17 = vadd.f32 %v2348_v43, %v2362_v50  ;;  %v771_v43 = vadd.f32 %v2360_v49, %v2374_v1  ;;  %v846_v50 = vadd.f32 %v811_v24, %v763_v18 }
 0x15b   : > { %v881_v36 = vmul.f32 1.442695, %v870_v31  ;;  %v856_v37 = vadd.f32 %v836_v12, %v789_v32  ;;  %v791_v38 = vadd.f32 %v790_v27, %v684_v35  ;;  %v871_v40 = vsub.f32 0.0, %v855_v34 }
 0x15c   : > { %v686_v55 = vpop.f32.mrf.mxu0  ;;  %v844_v23 = vadd.f32 %v806_v21, %v759_v17  ;;  %v847_v56 = vadd.f32 %v816_v8, %v767_v20  ;;  %v848_v26 = vadd.f32 %v816_v8, %v769_v22  ;;  %v849_v46 = vadd.f32 %v821_v13, %v771_v43  ;;  %v1803_v43 = vld [vmem:[%s2675_s6] sm:$0xff]  }
 0x15d   : > { %1823 = vpow2.f32 %v881_v36  ;;  %v872_v59 = vsub.f32 0.0, %v856_v37  ;;  %v857_v0 = vadd.f32 %v841_v30, %v791_v38  ;;  %v793_v5 = vadd.f32 %v792_v41, %v686_v55 }
 0x15e   : > { %v883_v7 = vmul.f32 1.442695, %v871_v40  ;;  %v761_v1 = vadd.f32 %v2350_v44, %v2366_v52  ;;  %v757_v34 = vadd.f32 %v2346_v42, %v2358_v48 }
 0x15f   : > { %v885_v9 = vmul.f32 1.442695, %v872_v59  ;;  %v873_v10 = vsub.f32 0.0, %v857_v0  ;;  %v858_v11 = vadd.f32 %v841_v30, %v793_v5 }
 0x160   : > { %1825 = vpow2.f32 %v883_v7  ;;  %v845_v36 = vadd.f32 %v811_v24, %v761_v1  ;;  %v843_v44 = vadd.f32 %v806_v21, %v757_v34  ;;  %v1816_v1 = vld [vmem:[%s2676_s7 + $0x68] sm:$0xff]  }
 0x161   : > { %1827 = vpow2.f32 %v885_v9  ;;  %v887_v12 = vmul.f32 1.442695, %v873_v10  ;;  %v874_v15 = vsub.f32 0.0, %v858_v11 }
 0x162   : > { %1829 = vpow2.f32 %v879_v6 }
 0x163   : > { %1831 = vpow2.f32 %v887_v12  ;;  %v889_v19 = vmul.f32 1.442695, %v874_v15 }
 0x164   : > { %1833 = vpow2.f32 %v875_v14 }
 0x165   : > { %1835 = vpow2.f32 %v889_v19 }
 0x166   : > { %v1822_v25 = vpop.eup %1821  ;;  %1837 = vtanh.f32 %v844_v23 }
 0x167   : > { %1839 = vtanh.f32 %v846_v50  ;;  %v892_v47 = vadd.f32 1.0, %v1822_v25  ;;  %v1805_v50 = vld [vmem:[%s2676_s7] sm:$0xff]  }
 0x168   : > { %1841 = vtanh.f32 %v847_v56  ;;  %v1807_v56 = vld [vmem:[%s2676_s7 + $0x8] sm:$0xff]   ;;  %v1806_v25 = vld [vmem:[%s2676_s7 + $0x40] sm:$0xff]  }
 0x169   : > { %1843 = vtanh.f32 %v848_v26  ;;  %v1809_v26 = vld [vmem:[%s2676_s7 + $0x10] sm:$0xff]  }
 0x16a   : > { %v1824_v27 = vpop.eup %1823  ;;  %1845 = vtanh.f32 %v849_v46  ;;  %v1811_v46 = vld [vmem:[%s2676_s7 + $0x18] sm:$0xff]  }
 0x16b   : > { %v894_v28 = vadd.f32 1.0, %v1824_v27  ;;  %1847 = vtanh.f32 %v850_v60  ;;  %v1808_v27 = vld [vmem:[%s2676_s7 + $0x48] sm:$0xff]   ;;  %v1810_v60 = vld [vmem:[%s2676_s7 + $0x50] sm:$0xff]  }
 0x16c   : > { %1849 = vrcp.f32 %v892_v47  ;;  %v1813_v47 = vld [vmem:[%s2676_s7 + $0x20] sm:$0xff]  }
 0x16d   : > { %v1826_v61 = vpop.eup %1825  ;;  %1851 = vrcp.f32 %v894_v28  ;;  %v1815_v28 = vld [vmem:[%s2676_s7 + $0x28] sm:$0xff]  }
 0x16e   : > { %v1828_v29 = vpop.eup %1827  ;;  %v895_v30 = vadd.f32 1.0, %v1826_v61  ;;  %v1812_v61 = vld [vmem:[%s2676_s7 + $0x58] sm:$0xff]  }
 0x16f   : > { %v1830_v49 = vpop.eup %1829  ;;  %v896_v51 = vadd.f32 1.0, %v1828_v29  ;;  %v1814_v29 = vld [vmem:[%s2676_s7 + $0x60] sm:$0xff]  }
 0x170   : > { %v1832_v2 = vpop.eup %1831  ;;  %v893_v35 = vadd.f32 1.0, %v1830_v49  ;;  %v1817_v49 = vld [vmem:[%s2676_s7 + $0x30] sm:$0xff]  }
 0x171   : > { %v1834_v31 = vpop.eup %1833  ;;  %v897_v32 = vadd.f32 1.0, %v1832_v2  ;;  %1853 = vrcp.f32 %v896_v51  ;;  %v1819_v51 = vld [vmem:[%s2676_s7 + $0x38] sm:$0xff]   ;;  %v1818_v2 = vld [vmem:[%s2676_s7 + $0x70] sm:$0xff]  }
 0x172   : > { %v1836_v33 = vpop.eup %1835  ;;  %v891_v38 = vadd.f32 1.0, %v1834_v31 }
 0x173   : > { %1855 = vrcp.f32 %v897_v32  ;;  %v898_v37 = vadd.f32 1.0, %v1836_v33  ;;  %v1838_v52 = vpop.eup %1837 }
 0x174   : > { %1857 = vrcp.f32 %v895_v30  ;;  %v1840_v39 = vpop.eup %1839  ;;  %v1820_v30 = vld [vmem:[%s2676_s7 + $0x78] sm:$0xff]  }
 0x175   : > { %1859 = vrcp.f32 %v898_v37  ;;  %v1842_v40 = vpop.eup %1841 }
 0x176   : > { %1861 = vrcp.f32 %v893_v35  ;;  %v1844_v41 = vpop.eup %1843 }
 0x177   : > { %1863 = vtanh.f32 %v845_v36  ;;  %v1846_v55 = vpop.eup %1845 }
 0x178   : > { %1865 = vrcp.f32 %v891_v38  ;;  %v1848_v59 = vpop.eup %1847 }
 0x179   : > { %1867 = vtanh.f32 %v843_v44  ;;  %v1850_v42 = vpop.eup %1849 }
 0x17a   : > { %v1852_v48 = vpop.eup %1851  ;;  %v908_v18 = vmul.f32 %v1850_v42, %v1838_v52 }
 0x17b   : > { %v910_v13 = vmul.f32 %v1852_v48, %v1840_v39 }
 0x17d   : > { %v916_v22 = vpack.c.bf16 %v910_v13, %v908_v18 }
 0x17e   : > { %v1854_v0 = vpop.eup %1853 }
 0x17f   : > { %v912_v10 = vmul.f32 %v1854_v0, %v1844_v41 }
 0x180   : > { %v1856_v5 = vpop.eup %1855 }
 0x181   : > { %v1858_v6 = vpop.eup %1857  ;;  %v913_v8 = vmul.f32 %v1856_v5, %v1846_v55 }
 0x182   : > { %v1860_v7 = vpop.eup %1859  ;;  %v911_v12 = vmul.f32 %v1858_v6, %v1842_v40 }
 0x183   : > { %v1862_v9 = vpop.eup %1861  ;;  %v914_v11 = vmul.f32 %v1860_v7, %v1848_v59 }
 0x184   : > { %v1864_v14 = vpop.eup %1863  ;;  %v917_v19 = vpack.c.bf16 %v913_v8, %v911_v12 }
 0x185   : > { %v1866_v15 = vpop.eup %1865  ;;  %v918_v17 = vpack.c.bf16 %v914_v11, %v912_v10  ;;  %v909_v20 = vmul.f32 %v1864_v14, %v1862_v9 }
 0x186   : > { %v1868_v21 = vpop.eup %1867 }
 0x187   : > { %952 = vmatprep.subr.bf16.mxu1 %v918_v17  ;;  %1173 = vmatprep.subr.bf16.mxu0 %v918_v17  ;;  %v907_v23 = vmul.f32 %v1868_v21, %v1866_v15 }
 0x188   : > { %953 = vmatpush1.bf16.msra.mxu1 %v917_v19  ;;  %1174 = vmatpush1.bf16.msra.mxu0 %v917_v19 }
 0x189   : > { %954 = vmatprep.subr.bf16.mxu1 %v916_v22  ;;  %1175 = vmatprep.subr.bf16.mxu0 %v916_v22  ;;  %v915_v24 = vpack.c.bf16 %v909_v20, %v907_v23 }
 0x18c   : > { %955 = vmatpush1.bf16.msra.mxu1 %v915_v24  ;;  %1176 = vmatpush1.bf16.msra.mxu0 %v915_v24 }
 0x18d   : > { %1703 = vmatprep.subr.bf16.mxu1 %v918_v17 }
 0x18f   : > { %1659 = vmatmul.mubr.msk.bf16.vlgmr.msra.gmra.mxu1 %vm933_vm1, %v1803_v43  ;;  %1677 = vmatmul.mubr.msk.bf16.vlgmr.msra.gmra.mxu0 %vm933_vm1, %v1805_v50 }
 0x190   : > { %1705 = vmatpush1.bf16.msra.mxu1 %v917_v19  ;;  %982 = vmatprep.mubr.bf16.mxu1 %v2027_v16 }
 0x191   : > { %1704 = vmatprep.subr.bf16.mxu1 %v916_v22  ;;  %1203 = vmatprep.mubr.bf16.mxu0 %v2027_v16 }
 0x194   : > { %1706 = vmatpush1.bf16.msra.mxu1 %v915_v24 }
 0x197   : > { %1660 = vmatmul.mubr.msk.bf16.gmra.mxu1 %vm933_vm1, %v1804_v45  ;;  %1678 = vmatmul.mubr.msk.bf16.gmra.mxu0 %vm933_vm1, %v1807_v56 }
 0x198   : > { %1273 = vmatprep.mubr.bf16.mxu1 %v2027_v16  ;;  %1213 = vmatprep.mubr.bf16.mxu0 %v2027_v16 }
 0x19f   : > { %1685 = vmatmul.mubr.msk.bf16.vlgmr.msra.gmra.mxu1 %vm933_vm1, %v1806_v25  ;;  %1679 = vmatmul.mubr.msk.bf16.gmra.mxu0 %vm933_vm1, %v1809_v26 }
 0x1a0   : > { %1283 = vmatprep.mubr.bf16.mxu1 %v2027_v16  ;;  %1223 = vmatprep.mubr.bf16.mxu0 %v2027_v16 }
 0x1a7   : > { %1686 = vmatmul.mubr.msk.bf16.gmra.mxu1 %vm933_vm1, %v1808_v27  ;;  %1680 = vmatmul.mubr.msk.bf16.gmra.mxu0 %vm933_vm1, %v1811_v46 }
 0x1a8   : > { %1293 = vmatprep.mubr.bf16.mxu1 %v2027_v16  ;;  %1233 = vmatprep.mubr.bf16.mxu0 %v2027_v16 }
 0x1af   : > { %1687 = vmatmul.mubr.msk.bf16.gmra.mxu1 %vm933_vm1, %v1810_v60  ;;  %1681 = vmatmul.mubr.msk.bf16.gmra.mxu0 %vm933_vm1, %v1813_v47 }
 0x1b0   : > { %1303 = vmatprep.mubr.bf16.mxu1 %v2027_v16  ;;  %1243 = vmatprep.mubr.bf16.mxu0 %v2027_v16 }
 0x1b7   : > { %1688 = vmatmul.mubr.msk.bf16.gmra.mxu1 %vm933_vm1, %v1812_v61  ;;  %1682 = vmatmul.mubr.msk.bf16.gmra.mxu0 %vm933_vm1, %v1815_v28 }
 0x1b8   : > { %1313 = vmatprep.mubr.bf16.mxu1 %v2027_v16  ;;  %1253 = vmatprep.mubr.bf16.mxu0 %v2027_v16 }
 0x1bf   : > { %1689 = vmatmul.mubr.msk.bf16.gmra.mxu1 %vm933_vm1, %v1814_v29  ;;  %1683 = vmatmul.mubr.msk.bf16.gmra.mxu0 %vm933_vm1, %v1817_v49 }
 0x1c0   : > { %1323 = vmatprep.mubr.bf16.mxu1 %v2027_v16  ;;  %1263 = vmatprep.mubr.bf16.mxu0 %v2027_v16 }
 0x1c7   : > { %1690 = vmatmul.mubr.msk.bf16.gmra.mxu1 %vm933_vm1, %v1816_v1  ;;  %1684 = vmatmul.mubr.msk.bf16.gmra.mxu0 %vm933_vm1, %v1819_v51 }
 0x1c8   : > { %1333 = vmatprep.mubr.bf16.mxu1 %v2027_v16 }
 0x1cf   : > { %1691 = vmatmul.mubr.msk.bf16.gmra.mxu1 %vm933_vm1, %v1818_v2 }
 0x1d0   : > { %1343 = vmatprep.mubr.bf16.mxu1 %v2027_v16 }
 0x1d7   : > { %1692 = vmatmul.mubr.msk.bf16.gmra.mxu1 %vm933_vm1, %v1820_v30 }
 0x24f   : > { %v974_v31 = vpop.f32.mrf.mxu1  ;;  %v1195_v32 = vpop.f32.mrf.mxu0 }
 0x250   : > { %v975_v33 = vadd.f32 %v974_v31, %v2267_v3  ;;  %1354 = vst [vmem:[%s2484_s26] sm:$0xff] %v1195_v32 }
 0x251   : > { %v976_v16 = vpop.f32.mrf.mxu1  ;;  %v1197_v34 = vpop.f32.mrf.mxu0 }
 0x252   : > { %993 = vst [vmem:[%s2488_s0] sm:$0xff] %v975_v33  ;;  %v977_v35 = vadd.f32 %v976_v16, %v2258_v62  ;;  %1355 = vst [vmem:[%s2484_s26 + $0x8] sm:$0xff] %v1197_v34 }
 0x253   : > { %v978_v3 = vpop.f32.mrf.mxu1  ;;  %v1199_v36 = vpop.f32.mrf.mxu0 }
 0x254   : > { %994 = vst [vmem:[%s2488_s0 + $0x8] sm:$0xff] %v977_v35  ;;  %v979_v37 = vadd.f32 %v978_v3, %v2270_v4  ;;  %1356 = vst [vmem:[%s2484_s26 + $0x10] sm:$0xff] %v1199_v36 }
 0x255   : > { %v980_v38 = vpop.f32.mrf.mxu1  ;;  %v1201_v44 = vpop.f32.mrf.mxu0 }
 0x256   : > { %995 = vst [vmem:[%s2488_s0 + $0x10] sm:$0xff] %v979_v37  ;;  %v981_v62 = vadd.f32 %v980_v38, %v2261_v63  ;;  %1357 = vst [vmem:[%s2484_s26 + $0x18] sm:$0xff] %v1201_v44 }
 0x257   : > { %v984_v52 = vpop.f32.mrf.mxu1  ;;  %v1205_v39 = vpop.f32.mrf.mxu0 }
 0x258   : > { %996 = vst [vmem:[%s2488_s0 + $0x18] sm:$0xff] %v981_v62  ;;  %v985_v4 = vadd.f32 %v984_v52, %v2249_v57  ;;  %1358 = vst [vmem:[%s2484_s26 + $0x20] sm:$0xff] %v1205_v39 }
 0x259   : > { %v986_v40 = vpop.f32.mrf.mxu1  ;;  %v1207_v41 = vpop.f32.mrf.mxu0 }
 0x25a   : > { %997 = vst [vmem:[%s2488_s0 + $0x20] sm:$0xff] %v985_v4  ;;  %v987_v55 = vadd.f32 %v986_v40, %v2240_v53  ;;  %1359 = vst [vmem:[%s2484_s26 + $0x28] sm:$0xff] %v1207_v41 }
 0x25b   : > { %v988_v63 = vpop.f32.mrf.mxu1  ;;  %v1209_v59 = vpop.f32.mrf.mxu0 }
 0x25c   : > { %998 = vst [vmem:[%s2488_s0 + $0x28] sm:$0xff] %v987_v55  ;;  %v989_v57 = vadd.f32 %v988_v63, %v2252_v58  ;;  %1360 = vst [vmem:[%s2484_s26 + $0x30] sm:$0xff] %v1209_v59 }
 0x25d   : > { %v990_v42 = vpop.f32.mrf.mxu1  ;;  %v1211_v48 = vpop.f32.mrf.mxu0 }
 0x25e   : > { %999 = vst [vmem:[%s2488_s0 + $0x30] sm:$0xff] %v989_v57  ;;  %v991_v53 = vadd.f32 %v990_v42, %v2243_v54  ;;  %1361 = vst [vmem:[%s2484_s26 + $0x38] sm:$0xff] %v1211_v48 }
 0x25f   : > { %v1275_v0 = vpop.f32.mrf.mxu1  ;;  %v1215_v5 = vpop.f32.mrf.mxu0 }
 0x260   : > { %1000 = vst [vmem:[%s2488_s0 + $0x38] sm:$0xff] %v991_v53  ;;  %1386 = vst [vmem:[%s2484_s26 + $0x100] sm:$0xff] %v1275_v0 }
 0x261   : > { %1362 = vst [vmem:[%s2484_s26 + $0x40] sm:$0xff] %v1215_v5  ;;  %v1277_v58 = vpop.f32.mrf.mxu1  ;;  %v1217_v6 = vpop.f32.mrf.mxu0 }
 0x262   : > { %1908 = shalt.err (!%p1905_p5)
}
 0x263   : > { %s1909_s21 = scalar_lea.hbm %s2518_s28, 1024  ;;  %s1913_s11 = scalar_lea.hbm %s2677_s8, 4096 }
 0x264   : > { %p1910_p6 = scmp.ne.s32.totalorder %s2518_s28, %s1909_s21  ;;  %p1914_p11 = scmp.lt.s32.totalorder %s2518_s28, %s2677_s8 }
 0x265   : > { %p1915_p13 = scmp.lt.s32.totalorder %s1913_s11, %s1909_s21 }
 0x266   : > { %p1911_p7 = pnand %p1910_p6, %p2147_p9 }
 0x267   : > { %p1916_p3 = por %p1915_p13, %p1914_p11 }
 0x268   : > { %p1912_p10 = pneg %p1911_p7 }
 0x26a   : > { %p1917_p8 = pnand %p1916_p3, %p1912_p10 }
 0x26c   : > { %1920 = shalt.err (!%p1917_p8)
}
 0x26d   : > { %s2029_s14 = smov 256   ;;  %s2030_s22 = smov 512   ;;  %1387 = vst [vmem:[%s2484_s26 + $0x108] sm:$0xff] %v1277_v58  ;;  %1363 = vst [vmem:[%s2484_s26 + $0x48] sm:$0xff] %v1217_v6  ;;  %v1279_v54 = vpop.f32.mrf.mxu1  ;;  %v1219_v7 = vpop.f32.mrf.mxu0 }
 0x26e   : > { %s2031_s20 = smov 16   ;;  %1388 = vst [vmem:[%s2484_s26 + $0x110] sm:$0xff] %v1279_v54  ;;  %1364 = vst [vmem:[%s2484_s26 + $0x50] sm:$0xff] %v1219_v7  ;;  %s1457_s23 = sshll.u32 %s2484_s26, 4  ;;  %s2614_s23 = int_to_ptr.vmem [resolvable:$true] %s1457_s23 }
 0x26f   : > { %1710 = dma.vmem_to_hbm [thread:$0]  (%p2147_p9), %s2510_s19, 1024, %s2518_s28, %s1419_s27, %s2029_s14, %s2030_s22, %s2031_s20   ;;  %v1281_v8 = vpop.f32.mrf.mxu1  ;;  %v1221_v9 = vpop.f32.mrf.mxu0 }
 0x270   : > { %1389 = vst [vmem:[%s2484_s26 + $0x118] sm:$0xff] %v1281_v8  ;;  %1365 = vst [vmem:[%s2484_s26 + $0x58] sm:$0xff] %v1221_v9  ;;  %s1699_s19 = sshll.u32 %s2009_s13, 7  ;;  %s2702_s21 = sld [smem:[#allocation22_spill]] }
 0x271   : > { %v1285_v10 = vpop.f32.mrf.mxu1  ;;  %v1225_v11 = vpop.f32.mrf.mxu0  ;;  %s1454_s28 = sadd.s32 %s1699_s19, %s1695_s29  ;;  %s1424_s12 = scalar_lea.sflag [#allocation9], %s2191_s9 }
 0x272   : > { %1390 = vst [vmem:[%s2484_s26 + $0x120] sm:$0xff] %v1285_v10  ;;  %1366 = vst [vmem:[%s2484_s26 + $0x60] sm:$0xff] %v1225_v11  ;;  %s1700_s27 = sshll.u32 %s1454_s28, 7  ;;  %s1921_s29 = scalar_lea.vmem %s2614_s23, 8192 }
 0x273   : > { %v1287_v13 = vpop.f32.mrf.mxu1  ;;  %v1227_v14 = vpop.f32.mrf.mxu0  ;;  %p1922_p0 = scmp.ne.s32.totalorder %s2614_s23, %s1921_s29  ;;  %s2032_s25 = smov [#allocation8]  }
 0x274   : > { %1391 = vst [vmem:[%s2484_s26 + $0x128] sm:$0xff] %v1287_v13  ;;  %1367 = vst [vmem:[%s2484_s26 + $0x68] sm:$0xff] %v1227_v14  ;;  %s1925_s0 = sshll.u32 %s2032_s25, 4  ;;  %s1926_s0 = int_to_ptr.vmem [resolvable:$false] %s1925_s0 }
 0x275   : > { %v1289_v12 = vpop.f32.mrf.mxu1  ;;  %v1229_v15 = vpop.f32.mrf.mxu0  ;;  %p1923_p1 = pnand %p1922_p0, %p2147_p9  ;;  %s1927_s11 = scalar_lea.vmem %s1926_s0, 16384 }
 0x276   : > { %1392 = vst [vmem:[%s2484_s26 + $0x130] sm:$0xff] %v1289_v12  ;;  %1368 = vst [vmem:[%s2484_s26 + $0x70] sm:$0xff] %v1229_v15  ;;  %s2612_s13 = scalar_lea.hbm %s2702_s21, %s1700_s27  ;;  %p1928_p4 = scmp.lt.s32.totalorder %s2614_s23, %s1926_s0 }
 0x277   : > { %v1291_v17 = vpop.f32.mrf.mxu1  ;;  %v1231_v18 = vpop.f32.mrf.mxu0  ;;  %p1924_p2 = pneg %p1923_p1  ;;  %p1929_p5 = scmp.lt.s32.totalorder %s1927_s11, %s1921_s29 }
 0x278   : > { %1393 = vst [vmem:[%s2484_s26 + $0x138] sm:$0xff] %v1291_v17  ;;  %1369 = vst [vmem:[%s2484_s26 + $0x78] sm:$0xff] %v1231_v18 }
 0x279   : > { %v1295_v19 = vpop.f32.mrf.mxu1  ;;  %v1235_v20 = vpop.f32.mrf.mxu0  ;;  %p1930_p6 = por %p1929_p5, %p1928_p4 }
 0x27a   : > { %1394 = vst [vmem:[%s2484_s26 + $0x140] sm:$0xff] %v1295_v19  ;;  %1370 = vst [vmem:[%s2484_s26 + $0x80] sm:$0xff] %v1235_v20 }
 0x27b   : > { %v1297_v21 = vpop.f32.mrf.mxu1  ;;  %v1237_v22 = vpop.f32.mrf.mxu0  ;;  %p1931_p7 = pnand %p1930_p6, %p1924_p2 }
 0x27c   : > { %1395 = vst [vmem:[%s2484_s26 + $0x148] sm:$0xff] %v1297_v21  ;;  %1371 = vst [vmem:[%s2484_s26 + $0x88] sm:$0xff] %v1237_v22 }
 0x27d   : > { %v1299_v23 = vpop.f32.mrf.mxu1  ;;  %v1239_v24 = vpop.f32.mrf.mxu0 }
 0x27e   : > { %1396 = vst [vmem:[%s2484_s26 + $0x150] sm:$0xff] %v1299_v23  ;;  %1372 = vst [vmem:[%s2484_s26 + $0x90] sm:$0xff] %v1239_v24 }
 0x27f   : > { %v1301_v43 = vpop.f32.mrf.mxu1  ;;  %v1241_v50 = vpop.f32.mrf.mxu0 }
 0x280   : > { %1397 = vst [vmem:[%s2484_s26 + $0x158] sm:$0xff] %v1301_v43  ;;  %1373 = vst [vmem:[%s2484_s26 + $0x98] sm:$0xff] %v1241_v50 }
 0x281   : > { %v1305_v45 = vpop.f32.mrf.mxu1  ;;  %v1245_v56 = vpop.f32.mrf.mxu0 }
 0x282   : > { %1398 = vst [vmem:[%s2484_s26 + $0x160] sm:$0xff] %v1305_v45  ;;  %1374 = vst [vmem:[%s2484_s26 + $0xa0] sm:$0xff] %v1245_v56 }
 0x283   : > { %v1307_v25 = vpop.f32.mrf.mxu1  ;;  %v1247_v26 = vpop.f32.mrf.mxu0 }
 0x284   : > { %1399 = vst [vmem:[%s2484_s26 + $0x168] sm:$0xff] %v1307_v25  ;;  %1375 = vst [vmem:[%s2484_s26 + $0xa8] sm:$0xff] %v1247_v26 }
 0x285   : > { %v1309_v27 = vpop.f32.mrf.mxu1  ;;  %v1249_v46 = vpop.f32.mrf.mxu0 }
 0x286   : > { %1400 = vst [vmem:[%s2484_s26 + $0x170] sm:$0xff] %v1309_v27  ;;  %1376 = vst [vmem:[%s2484_s26 + $0xb0] sm:$0xff] %v1249_v46 }
 0x287   : > { %v1311_v60 = vpop.f32.mrf.mxu1  ;;  %v1251_v47 = vpop.f32.mrf.mxu0 }
 0x288   : > { %1401 = vst [vmem:[%s2484_s26 + $0x178] sm:$0xff] %v1311_v60  ;;  %1377 = vst [vmem:[%s2484_s26 + $0xb8] sm:$0xff] %v1251_v47 }
 0x289   : > { %v1315_v61 = vpop.f32.mrf.mxu1  ;;  %v1255_v28 = vpop.f32.mrf.mxu0 }
 0x28a   : > { %1402 = vst [vmem:[%s2484_s26 + $0x180] sm:$0xff] %v1315_v61  ;;  %1378 = vst [vmem:[%s2484_s26 + $0xc0] sm:$0xff] %v1255_v28 }
 0x28b   : > { %v1317_v29 = vpop.f32.mrf.mxu1  ;;  %v1257_v49 = vpop.f32.mrf.mxu0 }
 0x28c   : > { %1403 = vst [vmem:[%s2484_s26 + $0x188] sm:$0xff] %v1317_v29  ;;  %1379 = vst [vmem:[%s2484_s26 + $0xc8] sm:$0xff] %v1257_v49 }
 0x28d   : > { %v1319_v1 = vpop.f32.mrf.mxu1  ;;  %v1259_v51 = vpop.f32.mrf.mxu0 }
 0x28e   : > { %1404 = vst [vmem:[%s2484_s26 + $0x190] sm:$0xff] %v1319_v1  ;;  %1380 = vst [vmem:[%s2484_s26 + $0xd0] sm:$0xff] %v1259_v51 }
 0x28f   : > { %v1321_v2 = vpop.f32.mrf.mxu1  ;;  %v1261_v30 = vpop.f32.mrf.mxu0 }
 0x290   : > { %1405 = vst [vmem:[%s2484_s26 + $0x198] sm:$0xff] %v1321_v2  ;;  %1381 = vst [vmem:[%s2484_s26 + $0xd8] sm:$0xff] %v1261_v30 }
 0x291   : > { %v1325_v31 = vpop.f32.mrf.mxu1  ;;  %v1265_v32 = vpop.f32.mrf.mxu0 }
 0x292   : > { %1406 = vst [vmem:[%s2484_s26 + $0x1a0] sm:$0xff] %v1325_v31  ;;  %1382 = vst [vmem:[%s2484_s26 + $0xe0] sm:$0xff] %v1265_v32 }
 0x293   : > { %v1327_v33 = vpop.f32.mrf.mxu1  ;;  %v1267_v16 = vpop.f32.mrf.mxu0 }
 0x294   : > { %1407 = vst [vmem:[%s2484_s26 + $0x1a8] sm:$0xff] %v1327_v33  ;;  %1383 = vst [vmem:[%s2484_s26 + $0xe8] sm:$0xff] %v1267_v16 }
 0x295   : > { %v1329_v34 = vpop.f32.mrf.mxu1  ;;  %v1269_v35 = vpop.f32.mrf.mxu0 }
 0x296   : > { %1408 = vst [vmem:[%s2484_s26 + $0x1b0] sm:$0xff] %v1329_v34  ;;  %1384 = vst [vmem:[%s2484_s26 + $0xf0] sm:$0xff] %v1269_v35 }
 0x297   : > { %v1331_v3 = vpop.f32.mrf.mxu1  ;;  %v1271_v36 = vpop.f32.mrf.mxu0 }
 0x298   : > { %1409 = vst [vmem:[%s2484_s26 + $0x1b8] sm:$0xff] %v1331_v3  ;;  %1385 = vst [vmem:[%s2484_s26 + $0xf8] sm:$0xff] %v1271_v36 }
 0x299   : > { %v1335_v37 = vpop.f32.mrf.mxu1 }
 0x29a   : > { %1410 = vst [vmem:[%s2484_s26 + $0x1c0] sm:$0xff] %v1335_v37 }
 0x29b   : > { %v1337_v38 = vpop.f32.mrf.mxu1 }
 0x29c   : > { %1411 = vst [vmem:[%s2484_s26 + $0x1c8] sm:$0xff] %v1337_v38 }
 0x29d   : > { %v1339_v44 = vpop.f32.mrf.mxu1 }
 0x29e   : > { %1412 = vst [vmem:[%s2484_s26 + $0x1d0] sm:$0xff] %v1339_v44 }
 0x29f   : > { %v1341_v62 = vpop.f32.mrf.mxu1 }
 0x2a0   : > { %1413 = vst [vmem:[%s2484_s26 + $0x1d8] sm:$0xff] %v1341_v62 }
 0x2a1   : > { %v1345_v52 = vpop.f32.mrf.mxu1 }
 0x2a2   : > { %1414 = vst [vmem:[%s2484_s26 + $0x1e0] sm:$0xff] %v1345_v52 }
 0x2a3   : > { %v1347_v39 = vpop.f32.mrf.mxu1 }
 0x2a4   : > { %1415 = vst [vmem:[%s2484_s26 + $0x1e8] sm:$0xff] %v1347_v39 }
 0x2a5   : > { %v1349_v4 = vpop.f32.mrf.mxu1 }
 0x2a6   : > { %1416 = vst [vmem:[%s2484_s26 + $0x1f0] sm:$0xff] %v1349_v4 }
 0x2a7   : > { %v1351_v40 = vpop.f32.mrf.mxu1 }
 0x2a8   : > { %1417 = vst [vmem:[%s2484_s26 + $0x1f8] sm:$0xff] %v1351_v40 }
 0x2a9   : > { %1934 = shalt.err (!%p1931_p7)
}
 0x2aa   : > { %s1935_s26 = scalar_lea.hbm %s2612_s13, 8192  ;;  %s1939_s1 = scalar_lea.hbm %s2702_s21, 32768 }
 0x2ab   : > { %p1936_p10 = scmp.ne.s32.totalorder %s2612_s13, %s1935_s26  ;;  %p1940_p3 = scmp.lt.s32.totalorder %s2612_s13, %s2702_s21 }
 0x2ac   : > { %p1941_p8 = scmp.lt.s32.totalorder %s1939_s1, %s1935_s26 }
 0x2ad   : > { %p1937_p11 = pnand %p1936_p10, %p2147_p9 }
 0x2ae   : > { %p1942_p0 = por %p1941_p8, %p1940_p3 }
 0x2af   : > { %p1938_p13 = pneg %p1937_p11 }
 0x2b1   : > { %p1943_p1 = pnand %p1942_p0, %p1938_p13 }
 0x2b3   : > { %1946 = shalt.err (!%p1943_p1)
}
 0x2b4   : > { %1711 = dma.vmem_to_hbm [thread:$0]  (%p2147_p9), %s2614_s23, 8192, %s2612_s13, %s1424_s12, %s2029_s14, %s2030_s22, %s2031_s20  }
 0x2b5 PF: > { %s2703_s27 = sld [smem:[#allocation13_spill]]  ;;  %p1721_p2 = scmp.ge.s32.totalorder %s2021_s16, 2 }
 0x2b7   : > { %p1715_p4 = pnand %p1721_p2, %p2154_p12 }
 0x2b9   : > { %p1716_p5 = pneg %p1715_p4 }
 0x2bb   : > { %s1472_s18 = sand.u32 1, %s2703_s27  }
 0x2bc   : > { %s1473_s29 = scalar_lea.sflag [#allocation6], %s1472_s18 }
 0x2bd   : > { %1984 = dma.done.wait (%p1716_p5), %s1473_s29, 1024  }
 0x2be   : > { %1986 = vsyncadd (%p1716_p5), %s1473_s29, 4294966272  ;;  %s1482_s25 = scalar_lea.sflag [#allocation9], %s1472_s18 }
 0x2bf   : > { %1988 = dma.done.wait (%p1716_p5), %s1482_s25, 8192  }
 0x2c0   : > { %1990 = vsyncadd (%p1716_p5), %s1482_s25, 4294959104  ;;  %s29_s16 = sadd.s32 1, %s2021_s16   ;;  %s2705_s24 = sld [smem:[#allocation14_spill]] }
 0x2c1   : > { %p26_p6 = scmp.ge.s32.totalorder %s29_s16, 6   ;;  %s2706_s11 = sld [smem:[#allocation19_spill]] }
 0x2c2   : > { %s2707_s12 = sld [smem:[#allocation15_spill]]  ;;  %s2710_s30 = smov %s1997_s10 }
 0x2c3   : > { %s2708_s14 = sld [smem:[#allocation16_spill]]  ;;  %s2712_s13 = smov %s2017_s15 }
 0x2c4   : > { %s2709_s22 = sld [smem:[#allocation17_spill]] }
 0x2c6   : > { %s2711_s10 = smov %s2705_s24  ;;  %28 = sbr.rel (!%p26_p6) target bundleno = 13 (0xd), region = 176 }
 0x2ca   : > { %s2713_s15 = smov %s2709_s22 }
 0x2cb   :  { %1487 = vsyncpa [#allocation5], 1 }
 0x2cc   :  { %1489 = vsyncpa [#allocation5 + $0x1], 1 }
 0x2cd   :  { %1490 = vsyncpa [#allocation6], 1 }
 0x2ce   :  { %1492 = vsyncpa [#allocation6 + $0x1], 1 }
 0x2cf   :  { %1493 = vsyncpa [#allocation9], 1 }
 0x2d0   :  { %1495 = vsyncpa [#allocation9 + $0x1], 1 }

</bundles_post_ra>
